<compile_context>
chip_gen: v5e
topology: v5e:2x2
jax: 0.10.0
libtpu: 0.0.40
codegen_flags: <defaults>
</compile_context>

<pallas_src>
import jax
import jax.numpy as jnp
from jax.experimental import pallas as pl
from jax.experimental.pallas import tpu as pltpu


def conv_bn_relu_kernel(x_ref, w_ref, bias_ref, o_ref):
    """One (batch, row-tile) step of fused 3x3 conv + BN + ReLU.

    x_ref:    (H+2, (W+2)*Cin) f32   padded input image, lane = w-major/c-minor
    w_ref:    (3, (W+2)*Cin, W*Cout) bf16  block-Toeplitz weights (BN scale folded in)
    bias_ref: (1, W*Cout)      f32   BN shift tiled per output column
    o_ref:    (TH, W*Cout)     f32   output row-tile (lane-dense: W*Cout)
    """
    TH, WC = o_ref.shape
    t = pl.program_id(1)
    row0 = pl.multiple_of(t * TH, TH)

    acc = jnp.zeros((TH, WC), jnp.float32)
    # 3 kernel-row taps -> 3 accumulated MXU matmuls with K=(W+2)*Cin, N=W*Cout.
    for kh in range(3):
        lhs = x_ref[pl.ds(row0 + kh, TH), :].astype(jnp.bfloat16)
        acc = acc + jnp.dot(lhs, w_ref[kh],
                            preferred_element_type=jnp.float32)

    # f32 epilogue: BN shift + ReLU (scale already folded into the weights).
    y = acc + bias_ref[...]
    o_ref[...] = jnp.maximum(y, 0.0).astype(o_ref.dtype)


def conv_bn_relu(x_nchw, weight_oihw, gamma, beta, running_mean, running_var,
                 eps=1e-5, row_tile=8):
    """x_nchw: (N, Cin, H, W) f32. Returns (N, Cout, H, W) f32."""
    N, Cin, H, W = x_nchw.shape
    Cout = weight_oihw.shape[0]
    KH = KW = 3
    TH = row_tile if H % row_tile == 0 else H

    # ---- one-time parameter transforms (wrapper, f32) -----------------------
    scale = gamma / jnp.sqrt(running_var + eps)            # BN (inference)
    bias = beta - running_mean * scale
    w_scaled = weight_oihw * scale[:, None, None, None]    # fold BN scale into conv
    w_hwio = jnp.transpose(w_scaled, (2, 3, 1, 0))         # (KH, KW, Cin, Cout)

    # Block-Toeplitz weight:
    #   Wt[kh, win*Cin+ci, w*Cout+co] = w_hwio[kh, win-w, ci, co] if 0 <= win-w < KW else 0
    # so a single matmul over the (win, ci) lane axis performs the kw/ci part
    # of the convolution and directly emits the lane-dense (w, co) output.
    kw_idx = jnp.arange(W + 2)[:, None] - jnp.arange(W)[None, :]      # (W+2, W)
    valid = (kw_idx >= 0) & (kw_idx < KW)
    taps = w_hwio[:, jnp.clip(kw_idx, 0, KW - 1)]                      # (KH, W+2, W, Cin, Cout)
    taps = jnp.where(valid[None, :, :, None, None], taps, 0.0)
    w_toep = jnp.transpose(taps, (0, 1, 3, 2, 4)).reshape(
        KH, (W + 2) * Cin, W * Cout).astype(jnp.bfloat16)

    bias_flat = jnp.tile(bias, W).reshape(1, W * Cout).astype(jnp.float32)

    # ---- activation layout glue ---------------------------------------------
    # TODO(synk): at realistic resolutions, fold the pad/transpose into the
    # kernel (zero-filled VMEM scratch + NCHW index_map) and halo-tile the input
    # block instead of shipping a whole padded image per batch element.
    x_nhwc = jnp.transpose(x_nchw, (0, 2, 3, 1))
    x_pad = jnp.pad(x_nhwc, ((0, 0), (1, 1), (1, 1), (0, 0)))
    x_flat = x_pad.reshape(N, H + 2, (W + 2) * Cin).astype(jnp.float32)

    out_flat = pl.pallas_call(
        conv_bn_relu_kernel,
        out_shape=jax.ShapeDtypeStruct((N, H, W * Cout), jnp.float32),
        grid_spec=pltpu.PrefetchScalarGridSpec(
            num_scalar_prefetch=0,
            grid=(N, H // TH),
            in_specs=[
                pl.BlockSpec((None, H + 2, (W + 2) * Cin),
                             lambda n, t: (n, 0, 0)),
                pl.BlockSpec((KH, (W + 2) * Cin, W * Cout),
                             lambda n, t: (0, 0, 0)),
                pl.BlockSpec((1, W * Cout), lambda n, t: (0, 0)),
            ],
            out_specs=pl.BlockSpec((None, TH, W * Cout),
                                   lambda n, t: (n, t, 0)),
        ),
        compiler_params=pltpu.CompilerParams(
            dimension_semantics=("parallel", "parallel")),
    )(x_flat, w_toep, bias_flat)

    out_nhwc = out_flat.reshape(N, H, W, Cout)
    return jnp.transpose(out_nhwc, (0, 3, 1, 2))           # -> NCHW


if __name__ == "__main__":
    # Module config: Conv(in_chans=4, out_chans=8, kernel_size=3) on a
    # (2, 4, 16, 16) NCHW input.
    N, Cin, H, W = 2, 4, 16, 16
    Cout = 8

    key = jax.random.PRNGKey(0)
    kx, kw, kg, kb, km, kv = jax.random.split(key, 6)

    x = jax.random.normal(kx, (N, Cin, H, W), dtype=jnp.float32)
    weight = jax.random.normal(kw, (Cout, Cin, 3, 3), dtype=jnp.float32) * 0.1
    gamma = 1.0 + 0.1 * jax.random.normal(kg, (Cout,), dtype=jnp.float32)
    beta = 0.1 * jax.random.normal(kb, (Cout,), dtype=jnp.float32)
    running_mean = 0.1 * jax.random.normal(km, (Cout,), dtype=jnp.float32)
    running_var = jnp.abs(1.0 + 0.1 * jax.random.normal(kv, (Cout,),
                                                        dtype=jnp.float32))

    out = conv_bn_relu(x, weight, gamma, beta, running_mean, running_var)
    out = jax.block_until_ready(out)

    # Plain-JAX f32 reference (conv + BN + ReLU).
    ref = jax.lax.conv_general_dilated(
        x, weight, window_strides=(1, 1), padding=((1, 1), (1, 1)),
        dimension_numbers=("NCHW", "OIHW", "NCHW"))
    scale = gamma / jnp.sqrt(running_var + 1e-5)
    bias = beta - running_mean * scale
    ref = jnp.maximum(ref * scale[None, :, None, None]
                      + bias[None, :, None, None], 0.0)

    assert out.shape == (N, Cout, H, W)
    max_err = float(jnp.max(jnp.abs(out - ref)))
    # bf16 MXU operands -> looser tolerance than the old pure-f32 path.
    assert max_err < 5e-2, f"max abs err {max_err}"

    print("KERNEL_OK")
</pallas_src>

<mosaic_0001>
module attributes {stable_mosaic.version = 11 : i64} {
  func.func @conv_bn_relu_kernel(%arg0: i32, %arg1: i32, %arg2: memref<1x18x72xf32, #tpu.memory_space<vmem>>, %arg3: memref<3x72x128xbf16, #tpu.memory_space<vmem>>, %arg4: memref<1x128xf32, #tpu.memory_space<vmem>>, %arg5: memref<1x8x128xf32, #tpu.memory_space<vmem>>) attributes {dimension_semantics = [#tpu.dimension_semantics<parallel>, #tpu.dimension_semantics<parallel>], iteration_bounds = array<i64: 2, 2>, scalar_prefetch = 0 : i64, scratch_operands = 0 : i64, tpu.core_type = #tpu.core_type<tc>, window_params = [{transform_indices = @transform_0, window_bounds = array<i64: 1, 18, 72>}, {pipeline_mode = #tpu.pipeline_mode<synchronous>, transform_indices = @transform_1, window_bounds = array<i64: 3, 72, 128>}, {pipeline_mode = #tpu.pipeline_mode<synchronous>, transform_indices = @transform_2, window_bounds = array<i64: 1, 128>}, {transform_indices = @transform_3, window_bounds = array<i64: 1, 8, 128>}]} {
    %c8_i32 = arith.constant 8 : i32
    %0 = arith.muli %arg1, %c8_i32 : i32
    %1 = tpu.assume_multiple %0, 8 : i32
    %cst = arith.constant 0.000000e+00 : f32
    %2 = vector.broadcast %cst : f32 to vector<8x128xf32>
    %c0_i32 = arith.constant 0 : i32
    %3 = arith.addi %1, %c0_i32 : i32
    %c0 = arith.constant 0 : index
    %4 = arith.index_cast %3 : i32 to index
    %c0_0 = arith.constant 0 : index
    %5 = vector.load %arg2[%c0, %4, %c0_0] : memref<1x18x72xf32, #tpu.memory_space<vmem>>, vector<1x8x72xf32>
    %6 = vector.shape_cast %5 : vector<1x8x72xf32> to vector<8x72xf32>
    %7 = arith.truncf %6 : vector<8x72xf32> to vector<8x72xbf16>
    %c0_1 = arith.constant 0 : index
    %c0_2 = arith.constant 0 : index
    %c0_3 = arith.constant 0 : index
    %8 = vector.load %arg3[%c0_1, %c0_2, %c0_3] : memref<3x72x128xbf16, #tpu.memory_space<vmem>>, vector<1x72x128xbf16>
    %9 = vector.shape_cast %8 : vector<1x72x128xbf16> to vector<72x128xbf16>
    %cst_4 = arith.constant dense<0.000000e+00> : vector<8x128xf32>
    %10 = tpu.matmul %7, %9, %cst_4 {dimension_numbers = #tpu.dot_dimension_numbers<[1], [0], [0], [1], [0, 0, 1, 1], [], []>} : vector<8x72xbf16>, vector<72x128xbf16>, vector<8x128xf32> -> vector<8x128xf32>
    %11 = arith.addf %2, %10 : vector<8x128xf32>
    %c1_i32 = arith.constant 1 : i32
    %12 = arith.addi %1, %c1_i32 : i32
    %c0_5 = arith.constant 0 : index
    %13 = arith.index_cast %12 : i32 to index
    %c0_6 = arith.constant 0 : index
    %14 = vector.load %arg2[%c0_5, %13, %c0_6] : memref<1x18x72xf32, #tpu.memory_space<vmem>>, vector<1x8x72xf32>
    %15 = vector.shape_cast %14 : vector<1x8x72xf32> to vector<8x72xf32>
    %16 = arith.truncf %15 : vector<8x72xf32> to vector<8x72xbf16>
    %c1 = arith.constant 1 : index
    %c0_7 = arith.constant 0 : index
    %c0_8 = arith.constant 0 : index
    %17 = vector.load %arg3[%c1, %c0_7, %c0_8] : memref<3x72x128xbf16, #tpu.memory_space<vmem>>, vector<1x72x128xbf16>
    %18 = vector.shape_cast %17 : vector<1x72x128xbf16> to vector<72x128xbf16>
    %cst_9 = arith.constant dense<0.000000e+00> : vector<8x128xf32>
    %19 = tpu.matmul %16, %18, %cst_9 {dimension_numbers = #tpu.dot_dimension_numbers<[1], [0], [0], [1], [0, 0, 1, 1], [], []>} : vector<8x72xbf16>, vector<72x128xbf16>, vector<8x128xf32> -> vector<8x128xf32>
    %20 = arith.addf %11, %19 : vector<8x128xf32>
    %c2_i32 = arith.constant 2 : i32
    %21 = arith.addi %1, %c2_i32 : i32
    %c0_10 = arith.constant 0 : index
    %22 = arith.index_cast %21 : i32 to index
    %c0_11 = arith.constant 0 : index
    %23 = vector.load %arg2[%c0_10, %22, %c0_11] : memref<1x18x72xf32, #tpu.memory_space<vmem>>, vector<1x8x72xf32>
    %24 = vector.shape_cast %23 : vector<1x8x72xf32> to vector<8x72xf32>
    %25 = arith.truncf %24 : vector<8x72xf32> to vector<8x72xbf16>
    %c2 = arith.constant 2 : index
    %c0_12 = arith.constant 0 : index
    %c0_13 = arith.constant 0 : index
    %26 = vector.load %arg3[%c2, %c0_12, %c0_13] : memref<3x72x128xbf16, #tpu.memory_space<vmem>>, vector<1x72x128xbf16>
    %27 = vector.shape_cast %26 : vector<1x72x128xbf16> to vector<72x128xbf16>
    %cst_14 = arith.constant dense<0.000000e+00> : vector<8x128xf32>
    %28 = tpu.matmul %25, %27, %cst_14 {dimension_numbers = #tpu.dot_dimension_numbers<[1], [0], [0], [1], [0, 0, 1, 1], [], []>} : vector<8x72xbf16>, vector<72x128xbf16>, vector<8x128xf32> -> vector<8x128xf32>
    %29 = arith.addf %20, %28 : vector<8x128xf32>
    %c0_15 = arith.constant 0 : index
    %c0_16 = arith.constant 0 : index
    %30 = vector.load %arg4[%c0_15, %c0_16] : memref<1x128xf32, #tpu.memory_space<vmem>>, vector<1x128xf32>
    %31 = vector.broadcast %30 : vector<1x128xf32> to vector<8x128xf32>
    %32 = arith.addf %29, %31 : vector<8x128xf32>
    %cst_17 = arith.constant 0.000000e+00 : f32
    %33 = vector.broadcast %cst_17 : f32 to vector<8x128xf32>
    %34 = arith.maximumf %32, %33 : vector<8x128xf32>
    %c0_18 = arith.constant 0 : index
    %c0_19 = arith.constant 0 : index
    %c0_20 = arith.constant 0 : index
    %35 = vector.load %arg5[%c0_18, %c0_19, %c0_20] : memref<1x8x128xf32, #tpu.memory_space<vmem>>, vector<1x8x128xf32>
    %36 = vector.shape_cast %35 : vector<1x8x128xf32> to vector<8x128xf32>
    %37 = vector.shape_cast %34 : vector<8x128xf32> to vector<1x8x128xf32>
    tpu.vector_store %arg5[%c0_18, %c0_19, %c0_20], %37 {strides = array<i32>} : memref<1x8x128xf32, #tpu.memory_space<vmem>>, vector<1x8x128xf32>,
    return
  }
  func.func @transform_0(%arg0: i32, %arg1: i32) -> (i32, i32, i32) {
    %c0_i32 = arith.constant 0 : i32
    %c0_i32_0 = arith.constant 0 : i32
    %c0_i32_1 = arith.constant 0 : i32
    return %arg0, %c0_i32, %c0_i32_0 : i32, i32, i32
  }
  func.func @transform_1(%arg0: i32, %arg1: i32) -> (i32, i32, i32) {
    %c0_i32 = arith.constant 0 : i32
    %c0_i32_0 = arith.constant 0 : i32
    %c0_i32_1 = arith.constant 0 : i32
    %c0_i32_2 = arith.constant 0 : i32
    return %c0_i32, %c0_i32_0, %c0_i32_1 : i32, i32, i32
  }
  func.func @transform_2(%arg0: i32, %arg1: i32) -> (i32, i32) {
    %c0_i32 = arith.constant 0 : i32
    %c0_i32_0 = arith.constant 0 : i32
    %c0_i32_1 = arith.constant 0 : i32
    return %c0_i32, %c0_i32_0 : i32, i32
  }
  func.func @transform_3(%arg0: i32, %arg1: i32) -> (i32, i32, i32) {
    %c0_i32 = arith.constant 0 : i32
    %c0_i32_0 = arith.constant 0 : i32
    return %arg0, %arg1, %c0_i32 : i32, i32, i32
  }
}

</mosaic_0001>

<bundles_post_ra>
// kernel: tpu_custom_call.1
= control target key start
LH: loop header
LB: loop body
LE: loop exit
PB: predicated region body
PF: predicated region fallthrough
CT: control target
= control target key end

     0   :  { %8 = vsyncpa [#allocation3], 0  ;;  %s966_s0 = inlined_call_operand.vmem [shape: f32[2,18,72], index: 0, kind: input, shape index: {}]   ;;  %s967_s1 = inlined_call_operand.hbm [shape: bf16[3,72,128], index: 1, kind: input, shape index: {}]   ;;  %s968_s2 = inlined_call_operand.vmem [shape: f32[1,128], index: 2, kind: input, shape index: {}]   ;;  %s969_s3 = inlined_call_operand.hbm [shape: f32[2,16,128], index: 3, kind: output, shape index: {}]  }
   0x1   :  { %9 = vsyncpa [#allocation4], 0 }
   0x2   :  { %11 = vsyncpa [#allocation4 + $0x1], 0  ;;  %s821_s12 = smov 0   ;;  %s823_s13 = smov 0  }
   0x3   :  { %s825_s14 = smov 0   ;;  %s827_s15 = smov 0  }
   0x4   :  { %s829_s16 = smov 0   ;;  %s831_s17 = smov 0  }
   0x5   :  { %s833_s18 = smov 0   ;;  %s835_s19 = smov 0  }
   0x6 LB: > { %s500_s20 = sadd.s32 4294967295, %s796_s19   ;;  %s501_s21 = sadd.s32 4294967294, %s796_s19   ;;  %s796_s19 = sphi %s835_s19, %s17_s19   ;;  %s792_s18 = sphi %s833_s18, %s980_s18   ;;  %s788_s17 = sphi %s831_s17, %s979_s17   ;;  %s784_s16 = sphi %s829_s16, %s978_s16   ;;  %s780_s15 = sphi %s827_s15, %s977_s15   ;;  %s776_s14 = sphi %s825_s14, %s976_s14   ;;  %s772_s13 = sphi %s823_s13, %s975_s13   ;;  %s768_s12 = sphi %s821_s12, %s974_s12  }
   0x7   : > { %s26_s22 = sadd.s32 1, %s788_s17  ;;  %s29_s23 = sadd.s32 1, %s792_s18 }
   0x8   : > { %p27_p0 = scmp.ge.s32.totalorder %s26_s22, 2  ;;  %s106_s24 = sadd.s32 1, %s776_s14 }
   0x9   : > { %p116_p1 = scmp.ne.s32.totalorder %s776_s14, %s772_s13  ;;  %p117_p2 = scmp.eq.s32.totalorder %s500_s20, 3 }
   0xa   : > { %s982_s22 = smov (%p27_p0, %s26_s22), 0  ;;  %s984_s23 = smov (!%p27_p0, %s29_s23), %s792_s18 }
   0xb   : > { %s102_s25 = ssub.s32 %s788_s17, %s982_s22  ;;  %p873_p3 = por %p117_p2, %p116_p1 }
   0xc   : > { %p31_p4 = scmp.ge.s32.totalorder %s984_s23, 2  ;;  %p122_p5 = scmp.ne.s32.totalorder %s772_s13, %s768_s12 }
   0xd   : > { %p123_p6 = scmp.eq.s32.totalorder %s501_s21, 3  ;;  %p502_p7 = scmp.ge.s32.totalorder %s796_s19, 1 }
   0xe   : > { %s986_s23 = smov (%p31_p4, %s984_s23), 0  ;;  %p130_p9 = scmp.lt.s32.totalorder %s796_s19, 5 }
   0xf   : > { %p882_p8 = por %p123_p6, %p122_p5  ;;  %s101_s28 = ssub.s32 %s792_s18, %s986_s23 }
  0x10   : > { %s103_s29 = sor.u32 %s102_s25, %s101_s28  ;;  %p889_p10 = pnand %p502_p7, %p130_p9 }
  0x11   : > { %p104_p11 = scmp.eq.s32.totalorder %s103_s29, 0  ;;  %p893_p12 = scmp.eq.s32.totalorder %s500_s20, 0 }
  0x12   : > { %p589_p13 = pneg %p889_p10  ;;  %s141_s7 = sshll.u32 %s967_s1, 4  ;;  %s142_s7 = int_to_ptr.hbm [resolvable:$true] %s141_s7 }
  0x13   : > { %s903_s8 = scalar_select %p104_p11, %s776_s14, %s106_s24  }
  0x14   : > { %s798_s9 = smov [#allocation2]   ;;  %p590_p0 = pnand %p893_p12, %p589_p13 }
  0x15   : > { %s143_s10 = sshll.u32 %s798_s9, 4  ;;  %s799_s11 = smov 64   ;;  %s144_s10 = int_to_ptr.vmem [resolvable:$true] %s143_s10 }
  0x16   : > { %s800_s20 = smov 4   ;;  %170 = sbr.rel (%p889_p10) target bundleno = 196 (0xc4), region = 32 }
  0x17   : > { %592 = dma.hbm_to_vmem [thread:$0]  (!%p590_p0), %s142_s7, 1728, %s144_s10, [#allocation3], %s799_s11, %s799_s11, %s800_s20  }
  0x1b   : > { %759 = dma.done.wait (%p893_p12), [#allocation3], 1728  }
  0x1c   : > { %761 = vsyncadd (%p893_p12), [#allocation3], 4294965568  ;;  %p195_p1 = scmp.lt.s32.totalorder %s784_s16, 1  ;;  %v227_v0 = vld [vmem:[#allocation2 + $0x44] sm:$0xf]  ;;  %vm259_vm0 = vcmask 1043456  }
  0x1d   : > { %v213_v1 = vld [vmem:[#allocation2 + $0x20] sm:$0xf]  ;;  %v335_v2 = vld [vmem:[#allocation2 + $0x68] sm:$0xf]  ;;  %v245_v3 = vunpack.c.l.b16 %v227_v0  ;;  %v573_v13 = vld [vmem:[#allocation2 + $0x18] sm:$0xff]  ;;  %s509_s30 = sshll.u32 %s780_s15, 3 }
  0x1e   : > { %v293_v4 = vunpack.c.l.b16 %v213_v1  ;;  %v353_v5 = vunpack.c.l.b16 %v335_v2  ;;  %s196_s21 = scalar_select %p195_p1, %s784_s16, 1  ;;  %v577_v12 = vld [vmem:[#allocation2 + $0x3c] sm:$0xff]  ;;  %v576_v15 = vld [vmem:[#allocation2 + $0x34] sm:$0xff]  ;;  %v575_v18 = vld [vmem:[#allocation2 + $0x2c] sm:$0xff]  ;;  %vm255_vm1 = vcmask 588800  }
  0x1f   : > { %v250_v6 = vpack.c.b16 %v245_v3, %v245_v3  ;;  %v581_v14 = vld [vmem:[#allocation2 + $0x60] sm:$0xff]  ;;  %v572_v16 = vld [vmem:[#allocation2 + $0x10] sm:$0xff]  ;;  %v580_v17 = vld [vmem:[#allocation2 + $0x58] sm:$0xff]  ;;  %s566_s5 = sshll.u32 %s784_s16, 1  ;;  %s192_s6 = sand.u32 1, %s772_s13  }
  0x20   : > { %v298_v7 = vpack.c.b16 %v293_v4, %v293_v4  ;;  %v358_v8 = vpack.c.b16 %v353_v5, %v353_v5  ;;  %s582_s24 = smul.u32 24, %s196_s21  ;;  %v571_v19 = vld [vmem:[#allocation2 + $0x8] sm:$0xff]  ;;  %v579_v20 = vld [vmem:[#allocation2 + $0x50] sm:$0xff]  ;;  %v570_v22 = vld [vmem:[#allocation2] sm:$0xff]  ;;  %s401_s7 = sadd.s32 %s780_s15, %s566_s5 }
  0x21   : > { %v261_v9 = vsel %vm259_vm0, %v250_v6, 0  ;;  %v574_v21 = vld [vmem:[#allocation2 + $0x24] sm:$0xff]  ;;  %s507_s9 = sshll.u32 %s192_s6, 3  ;;  %s567_s10 = sshll.u32 %s401_s7, 3  ;;  %v667_v33 = vld [vmem:[%s968_s2] ss:$0 sm:$0xff] }
  0x22   : > { %v307_v10 = vsel %vm259_vm0, %v298_v7, 0  ;;  %v367_v11 = vsel %vm259_vm0, %v358_v8, 0  ;;  %266 = vmatpush.bf16.msra.mxu0 %v261_v9  ;;  %s199_s29 = scalar_lea.vmem %s966_s0, %s582_s24  ;;  %v578_v25 = vld [vmem:[#allocation2 + $0x48] sm:$0xff]  ;;  %s403_s25 = scalar_lea.hbm %s969_s3, %s567_s10 }
  0x23   : > { %312 = vmatpush.bf16.msra.mxu1 %v307_v10  ;;  %372 = vmatpush.bf16.msra.mxu2 %v367_v11  ;;  %s202_s4 = scalar_lea.vmem %s199_s29, %s509_s30  ;;  %s194_s16 = scalar_lea.vmem [#allocation5], %s507_s9 }
  0x24   : > { %v511_v23 = vld [vmem:[%s202_s4 + $0x1] sm:$0xff]  ;;  %s405_s28 = sshll.u32 %s194_s16, 4  ;;  %s407_s29 = sshll.u32 %s403_s25, 4  ;;  %s406_s28 = int_to_ptr.vmem [resolvable:$true] %s405_s28  ;;  %s408_s29 = int_to_ptr.hbm [resolvable:$true] %s407_s29 }
  0x25   : > { %v203_v24 = vld [vmem:[%s202_s4] sm:$0xff]  ;;  %v217_v27 = vpack.c.bf16 %v511_v23, %v511_v23  ;;  %s391_s15 = scalar_lea.sflag [#allocation4], %s192_s6  ;;  %s712_s30 = sshra.s32 %s408_s29, 4  ;;  %s713_s30 = int_to_ptr.hbm [resolvable:$true] %s712_s30 }
  0x26   : > { %267 = vmatpush.bf16.msra.mxu0 %v577_v12  ;;  %v547_v26 = vld [vmem:[%s202_s4 + $0x2] sm:$0xff]  ;;  %v204_v28 = vpack.c.bf16 %v203_v24, %v203_v24  ;;  %s714_s4 = scalar_lea.hbm %s713_s30, 8  ;;  %s718_s9 = scalar_lea.hbm %s969_s3, 32 }
  0x27   : > { %313 = vmatpush.bf16.msra.mxu1 %v573_v13  ;;  %373 = vmatpush.bf16.msra.mxu2 %v581_v14  ;;  %v325_v29 = vpack.c.bf16 %v547_v26, %v547_v26  ;;  %p715_p2 = scmp.ne.s32.totalorder %s713_s30, %s714_s4  ;;  %p719_p6 = scmp.lt.s32.totalorder %s713_s30, %s969_s3 }
  0x28   : > { %p720_p7 = scmp.lt.s32.totalorder %s718_s9, %s714_s4 }
  0x29   : > { %p716_p4 = pnand %p715_p2, %p873_p3 }
  0x2a   : > { %268 = vmatpush.bf16.msra.mxu0 %v576_v15  ;;  %p721_p9 = por %p720_p7, %p719_p6 }
  0x2b   : > { %314 = vmatpush.bf16.msra.mxu1 %v572_v16  ;;  %374 = vmatpush.bf16.msra.mxu2 %v580_v17  ;;  %p717_p5 = pneg %p716_p4 }
  0x2d   : > { %p722_p10 = pnand %p721_p9, %p717_p5 }
  0x2e   : > { %269 = vmatpush.bf16.msra.mxu0 %v575_v18 }
  0x2f   : > { %315 = vmatpush.bf16.msra.mxu1 %v571_v19  ;;  %375 = vmatpush.bf16.msra.mxu2 %v579_v20 }
  0x32   : > { %270 = vmatpush.bf16.msra.mxu0 %v574_v21 }
  0x33   : > { %316 = vmatpush.bf16.msra.mxu1 %v570_v22  ;;  %376 = vmatpush.bf16.msra.mxu2 %v578_v25 }
  0x35   : > { %528 = vmatmul.msk.bf16.vlgmr.msra.gmra.mxu0 %vm255_vm1, %v217_v27 }
  0x36   : > { %545 = vmatmul.msk.bf16.vlgmr.msra.gmra.mxu1 %vm255_vm1, %v204_v28  ;;  %564 = vmatmul.msk.bf16.vlgmr.msra.gmra.mxu2 %vm255_vm1, %v325_v29 }
  0xb2   : > { %v272_v30 = vpop.f32.mrf.mxu0 }
  0xb3   : > { %v318_v31 = vpop.f32.mrf.mxu1 }
  0xb4   : > { %v319_v32 = vadd.f32 %v318_v31, %v272_v30 }
  0xb9   : > { %v378_v34 = vpop.f32.mrf.mxu2 }
  0xba   : > { %v382_v35 = vadd.f32 %v378_v34, %v319_v32  ;;  %v274_v36 = vpop.f32.mrf.mxu0 }
  0xbb   : > { %v320_v37 = vpop.f32.mrf.mxu1 }
  0xbc   : > { %v387_v38 = vadd.f32 %v667_v33, %v382_v35 }
  0xbe   : > { %v388_v39 = vmax.f32 %v387_v38, 0.0 }
  0xc0   : > { %389 = vst [vmem:[%s194_s16] sm:$0xff] %v388_v39 }
  0xc1   : > { %v380_v40 = vpop.f32.mrf.mxu2 }
  0xc2   : > { %725 = shalt.err (!%p722_p10)
}
  0xc3   : > { %587 = dma.vmem_to_hbm [thread:$0]  (%p873_p3), %s406_s28, 128, %s408_s29, %s391_s15  }
  0xc4 PF: > { %p599_p11 = scmp.ge.s32.totalorder %s796_s19, 2  ;;  %s419_s6 = sand.u32 1, %s768_s12  }
  0xc5   : > { %s420_s20 = scalar_lea.sflag [#allocation4], %s419_s6 }
  0xc6   : > { %p594_p12 = pnand %p599_p11, %p882_p8 }
  0xc8   : > { %p595_p13 = pneg %p594_p12 }
  0xca   : > { %763 = dma.done.wait (%p595_p13), %s420_s20, 128  }
  0xcb   : > { %765 = vsyncadd (%p595_p13), %s420_s20, 4294967168  ;;  %s17_s19 = sadd.s32 1, %s796_s19   ;;  %s974_s12 = smov %s772_s13 }
  0xcc   : > { %p14_p0 = scmp.ge.s32.totalorder %s17_s19, 6   ;;  %s975_s13 = smov %s776_s14 }
  0xcd   : > { %s976_s14 = smov %s903_s8  ;;  %s977_s15 = smov %s788_s17 }
  0xce   : > { %s978_s16 = smov %s792_s18  ;;  %s979_s17 = smov %s982_s22 }
  0xcf   : > { %s980_s18 = smov %s986_s23  ;;  %16 = sbr.rel (!%p14_p0) target bundleno = 6 (0x6), region = 77 }
  0xd4   :  { %426 = vsyncpa [#allocation3], 1 }
  0xd5   :  { %428 = vsyncpa [#allocation3 + $0x1], 1 }
  0xd6   :  { %429 = vsyncpa [#allocation4], 1 }
  0xd7   :  { %431 = vsyncpa [#allocation4 + $0x1], 1 }

</bundles_post_ra>
